<compile_context>
chip_gen: v5e
topology: v5e:2x2
jax: 0.10.0
libtpu: 0.0.40
codegen_flags: <defaults>
</compile_context>

<pallas_src>
import jax
import jax.numpy as jnp
from jax.experimental import pallas as pl
from jax.experimental.pallas import tpu as pltpu

C_IN, C_OUT, K, STRIDE, PAD = 6, 3, 2, 2, 24
NCOLS = C_OUT * K * K  # 12 output rows: j = co*K*K + kh*K + kw


def _convT_swish_kernel(x_ref, w_ref, b_ref, o_ref):
    # x_ref: (C_IN, TM)      lane-dense activations (M on lanes)
    # w_ref: (NCOLS, C_IN)   transposed weights
    # b_ref: (NCOLS, 1)      per-row bias
    # o_ref: (NCOLS, TM)     lane-dense output
    x = x_ref[...]
    w = w_ref[...]
    # z[j, m] = b[j] + sum_c w[j, c] * x[c, m] -- unrolled VPU broadcast-FMAs,
    # bias folded into the accumulator init.
    acc = b_ref[...] + w[:, 0:1] * x[0:1, :]
    for c in range(1, C_IN):
        acc = acc + w[:, c:c + 1] * x[c:c + 1, :]
    o_ref[...] = acc * jax.nn.sigmoid(acc)        # SiLU: v1 * sigmoid(v1)


def conv_transpose_swish(x_nchw, weight, bias, *, tm=2048):
    """ConvTranspose2d(6,3,2,stride=2,padding=24) + x*sigmoid(x).

    x_nchw: (N, C_IN, H, W); weight: (C_IN, C_OUT, K, K); bias: (C_OUT,).
    Returns (N, C_OUT, 2H - 2*PAD, 2W - 2*PAD), float32.
    """
    N, Cin, H, W = x_nchw.shape
    assert Cin == C_IN and K == STRIDE and PAD % STRIDE == 0
    lo = PAD // STRIDE
    Hs, Ws = H - PAD, W - PAD            # contributing input window
    assert Hs > 0 and Ws > 0, "input spatial size too small for padding=24"
    M = N * Hs * Ws
    M_pad = ((M + 127) // 128) * 128     # lane-dense (multiple of 128)
    tm = min(M_pad, ((tm + 127) // 128) * 128)
    grid = (pl.cdiv(M_pad, tm),)

    # Pre-slice: only the window that feeds the kept output; flatten batch+space
    # onto the lane axis.
    x_win = x_nchw[:, :, lo:lo + Hs, lo:lo + Ws]                 # (N, C_IN, Hs, Ws)
    x_t = jnp.transpose(x_win, (1, 0, 2, 3)).reshape(C_IN, M)    # (C_IN, M)
    if M_pad != M:
        x_t = jnp.pad(x_t, ((0, 0), (0, M_pad - M)))

    # weight (C_IN, C_OUT, K, K) -> (NCOLS, C_IN); row j = co*K*K + kh*K + kw
    w_t = jnp.transpose(weight, (1, 2, 3, 0)).reshape(NCOLS, C_IN)
    b_col = jnp.repeat(bias, K * K).reshape(NCOLS, 1)

    y_t = pl.pallas_call(
        _convT_swish_kernel,
        out_shape=jax.ShapeDtypeStruct((NCOLS, M_pad), jnp.float32),
        grid=grid,
        in_specs=[
            pl.BlockSpec((C_IN, tm), lambda i: (0, i)),
            pl.BlockSpec((NCOLS, C_IN), lambda i: (0, 0)),
            pl.BlockSpec((NCOLS, 1), lambda i: (0, 0)),
        ],
        out_specs=pl.BlockSpec((NCOLS, tm), lambda i: (0, i)),
        compiler_params=pltpu.CompilerParams(
            dimension_semantics=("parallel",)),
    )(x_t, w_t, b_col)

    # Scatter each (co, kh, kw) row into the 2x-upsampled, already-cropped grid
    # (single XLA transpose on the 16x-smaller kept output).
    y = y_t[:, :M].reshape(C_OUT, K, K, N, Hs, Ws)
    y = jnp.transpose(y, (3, 0, 4, 1, 5, 2))          # (n, co, ih, kh, iw, kw)
    return y.reshape(N, C_OUT, Hs * K, Ws * K)


def _reference(x, weight, bias):
    # Pure-JAX dense reference of ConvTranspose2d(stride=2,k=2,pad=24) + SiLU.
    N, _, H, W = x.shape
    t = jnp.einsum('ncij,cokl->noikjl', x, weight,
                   precision=jax.lax.Precision.HIGHEST)     # (N,C_OUT,H,K,W,K)
    full = t.reshape(N, C_OUT, H * K, W * K) + bias.reshape(1, C_OUT, 1, 1)
    v1 = full[:, :, PAD:H * STRIDE - PAD, PAD:W * STRIDE - PAD]
    return v1 * jax.nn.sigmoid(v1)


if __name__ == "__main__":
    # The spec's (1,6,14,14) input is invalid for padding=24 (negative output
    # size), so use a small valid, lane-friendly shape: H=W=40 -> 16x16 kept
    # window, N=2 -> M = 2*16*16 = 512; tm=128 exercises a 4-step parallel grid.
    N, H, W = 2, 40, 40
    key = jax.random.PRNGKey(0)
    kx, kwt, kb = jax.random.split(key, 3)

    x = jax.random.normal(kx, (N, C_IN, H, W), dtype=jnp.float32)
    fan_in = C_OUT * K * K                       # synthetic PyTorch-style init
    bound = 1.0 / (fan_in ** 0.5)
    weight = jax.random.uniform(kwt, (C_IN, C_OUT, K, K), jnp.float32, -bound, bound)
    bias = jax.random.uniform(kb, (C_OUT,), jnp.float32, -bound, bound)

    out = jax.block_until_ready(conv_transpose_swish(x, weight, bias, tm=128))
    assert out.shape == (N, C_OUT, 2 * (H - PAD), 2 * (W - PAD))

    ref = jax.block_until_ready(_reference(x, weight, bias))
    err = float(jnp.max(jnp.abs(out - ref)))
    assert jnp.allclose(out, ref, rtol=1e-5, atol=1e-5), err
    print("KERNEL_OK")
</pallas_src>

<mosaic_0001>
module attributes {stable_mosaic.version = 11 : i64} {
  func.func @_convT_swish_kernel(%arg0: i32, %arg1: memref<6x128xf32, #tpu.memory_space<vmem>>, %arg2: memref<12x6xf32, #tpu.memory_space<vmem>>, %arg3: memref<12x1xf32, #tpu.memory_space<vmem>>, %arg4: memref<12x128xf32, #tpu.memory_space<vmem>>) attributes {dimension_semantics = [#tpu.dimension_semantics<parallel>], iteration_bounds = array<i64: 4>, scalar_prefetch = 0 : i64, scratch_operands = 0 : i64, tpu.core_type = #tpu.core_type<tc>, window_params = [{transform_indices = @transform_0, window_bounds = array<i64: 6, 128>}, {pipeline_mode = #tpu.pipeline_mode<synchronous>, transform_indices = @transform_1, window_bounds = array<i64: 12, 6>}, {pipeline_mode = #tpu.pipeline_mode<synchronous>, transform_indices = @transform_2, window_bounds = array<i64: 12, 1>}, {transform_indices = @transform_3, window_bounds = array<i64: 12, 128>}]} {
    %c0 = arith.constant 0 : index
    %c0_0 = arith.constant 0 : index
    %0 = vector.load %arg1[%c0, %c0_0] : memref<6x128xf32, #tpu.memory_space<vmem>>, vector<6x128xf32>
    %c0_1 = arith.constant 0 : index
    %c0_2 = arith.constant 0 : index
    %1 = vector.load %arg2[%c0_1, %c0_2] : memref<12x6xf32, #tpu.memory_space<vmem>>, vector<12x6xf32>
    %c0_3 = arith.constant 0 : index
    %c0_4 = arith.constant 0 : index
    %2 = vector.load %arg3[%c0_3, %c0_4] : memref<12x1xf32, #tpu.memory_space<vmem>>, vector<12x1xf32>
    %3 = vector.extract_strided_slice %1 {offsets = [0, 0], sizes = [12, 1], strides = [1, 1]} : vector<12x6xf32> to vector<12x1xf32>
    %4 = vector.extract_strided_slice %0 {offsets = [0, 0], sizes = [1, 128], strides = [1, 1]} : vector<6x128xf32> to vector<1x128xf32>
    %5 = vector.broadcast %3 : vector<12x1xf32> to vector<12x128xf32>
    %6 = vector.broadcast %4 : vector<1x128xf32> to vector<12x128xf32>
    %7 = arith.mulf %5, %6 : vector<12x128xf32>
    %8 = vector.broadcast %2 : vector<12x1xf32> to vector<12x128xf32>
    %9 = arith.addf %8, %7 : vector<12x128xf32>
    %10 = vector.extract_strided_slice %1 {offsets = [0, 1], sizes = [12, 1], strides = [1, 1]} : vector<12x6xf32> to vector<12x1xf32>
    %11 = vector.extract_strided_slice %0 {offsets = [1, 0], sizes = [1, 128], strides = [1, 1]} : vector<6x128xf32> to vector<1x128xf32>
    %12 = vector.broadcast %10 : vector<12x1xf32> to vector<12x128xf32>
    %13 = vector.broadcast %11 : vector<1x128xf32> to vector<12x128xf32>
    %14 = arith.mulf %12, %13 : vector<12x128xf32>
    %15 = arith.addf %9, %14 : vector<12x128xf32>
    %16 = vector.extract_strided_slice %1 {offsets = [0, 2], sizes = [12, 1], strides = [1, 1]} : vector<12x6xf32> to vector<12x1xf32>
    %17 = vector.extract_strided_slice %0 {offsets = [2, 0], sizes = [1, 128], strides = [1, 1]} : vector<6x128xf32> to vector<1x128xf32>
    %18 = vector.broadcast %16 : vector<12x1xf32> to vector<12x128xf32>
    %19 = vector.broadcast %17 : vector<1x128xf32> to vector<12x128xf32>
    %20 = arith.mulf %18, %19 : vector<12x128xf32>
    %21 = arith.addf %15, %20 : vector<12x128xf32>
    %22 = vector.extract_strided_slice %1 {offsets = [0, 3], sizes = [12, 1], strides = [1, 1]} : vector<12x6xf32> to vector<12x1xf32>
    %23 = vector.extract_strided_slice %0 {offsets = [3, 0], sizes = [1, 128], strides = [1, 1]} : vector<6x128xf32> to vector<1x128xf32>
    %24 = vector.broadcast %22 : vector<12x1xf32> to vector<12x128xf32>
    %25 = vector.broadcast %23 : vector<1x128xf32> to vector<12x128xf32>
    %26 = arith.mulf %24, %25 : vector<12x128xf32>
    %27 = arith.addf %21, %26 : vector<12x128xf32>
    %28 = vector.extract_strided_slice %1 {offsets = [0, 4], sizes = [12, 1], strides = [1, 1]} : vector<12x6xf32> to vector<12x1xf32>
    %29 = vector.extract_strided_slice %0 {offsets = [4, 0], sizes = [1, 128], strides = [1, 1]} : vector<6x128xf32> to vector<1x128xf32>
    %30 = vector.broadcast %28 : vector<12x1xf32> to vector<12x128xf32>
    %31 = vector.broadcast %29 : vector<1x128xf32> to vector<12x128xf32>
    %32 = arith.mulf %30, %31 : vector<12x128xf32>
    %33 = arith.addf %27, %32 : vector<12x128xf32>
    %34 = vector.extract_strided_slice %1 {offsets = [0, 5], sizes = [12, 1], strides = [1, 1]} : vector<12x6xf32> to vector<12x1xf32>
    %35 = vector.extract_strided_slice %0 {offsets = [5, 0], sizes = [1, 128], strides = [1, 1]} : vector<6x128xf32> to vector<1x128xf32>
    %36 = vector.broadcast %34 : vector<12x1xf32> to vector<12x128xf32>
    %37 = vector.broadcast %35 : vector<1x128xf32> to vector<12x128xf32>
    %38 = arith.mulf %36, %37 : vector<12x128xf32>
    %39 = arith.addf %33, %38 : vector<12x128xf32>
    %40 = arith.negf %39 : vector<12x128xf32>
    %41 = math.exp %40 : vector<12x128xf32>
    %cst = arith.constant 1.000000e+00 : f32
    %42 = vector.broadcast %cst : f32 to vector<12x128xf32>
    %43 = arith.addf %42, %41 : vector<12x128xf32>
    %44 = arith.divf %42, %43 : vector<12x128xf32>
    %45 = arith.mulf %39, %44 : vector<12x128xf32>
    %c0_5 = arith.constant 0 : index
    %c0_6 = arith.constant 0 : index
    %46 = vector.load %arg4[%c0_5, %c0_6] : memref<12x128xf32, #tpu.memory_space<vmem>>, vector<12x128xf32>
    tpu.vector_store %arg4[%c0_5, %c0_6], %45 {strides = array<i32>} : memref<12x128xf32, #tpu.memory_space<vmem>>, vector<12x128xf32>,
    return
  }
  func.func @transform_0(%arg0: i32) -> (i32, i32) {
    %c0_i32 = arith.constant 0 : i32
    %c0_i32_0 = arith.constant 0 : i32
    return %c0_i32, %arg0 : i32, i32
  }
  func.func @transform_1(%arg0: i32) -> (i32, i32) {
    %c0_i32 = arith.constant 0 : i32
    %c0_i32_0 = arith.constant 0 : i32
    %c0_i32_1 = arith.constant 0 : i32
    return %c0_i32, %c0_i32_0 : i32, i32
  }
  func.func @transform_2(%arg0: i32) -> (i32, i32) {
    %c0_i32 = arith.constant 0 : i32
    %c0_i32_0 = arith.constant 0 : i32
    %c0_i32_1 = arith.constant 0 : i32
    return %c0_i32, %c0_i32_0 : i32, i32
  }
  func.func @transform_3(%arg0: i32) -> (i32, i32) {
    %c0_i32 = arith.constant 0 : i32
    %c0_i32_0 = arith.constant 0 : i32
    return %c0_i32, %arg0 : i32, i32
  }
}

</mosaic_0001>

<bundles_post_ra>
// kernel: tpu_custom_call.1
= control target key start
LH: loop header
LB: loop body
LE: loop exit
PB: predicated region body
PF: predicated region fallthrough
CT: control target
= control target key end

     0   :  { %8 = vsyncpa [#allocation3], 0  ;;  %s654_s0 = inlined_call_operand.vmem [shape: f32[6,512], index: 0, kind: input, shape index: {}]   ;;  %s655_s1 = inlined_call_operand.vmem [shape: f32[12,6], index: 1, kind: input, shape index: {}]   ;;  %s656_s2 = inlined_call_operand.vmem [shape: f32[12,1], index: 2, kind: input, shape index: {}]   ;;  %s657_s3 = inlined_call_operand.hbm [shape: f32[12,512], index: 3, kind: output, shape index: {}]  }
   0x1   :  { %10 = vsyncpa [#allocation3 + $0x1], 0  ;;  %s553_s12 = smov 0   ;;  %s555_s13 = smov 0  }
   0x2   :  { %s557_s14 = smov 0   ;;  %s559_s15 = smov 0  }
   0x3 LB: > { %s574_s16 = sadd.s32 4294967295, %s522_s15   ;;  %s380_s17 = sadd.s32 4294967294, %s522_s15   ;;  %s522_s15 = sphi %s559_s15, %s663_s15   ;;  %s518_s14 = sphi %s557_s14, %s662_s14   ;;  %s514_s13 = sphi %s555_s13, %s661_s13   ;;  %s510_s12 = sphi %s553_s12, %s660_s12  }
   0x4   : > { %s578_s18 = sadd.s32 1, %s522_s15   ;;  %s91_s19 = sadd.s32 1, %s518_s14 }
   0x5   : > { %s88_s20 = ssub.s32 %s522_s15, %s578_s18  ;;  %p101_p0 = scmp.ne.s32.totalorder %s518_s14, %s514_s13 }
   0x6   : > { %p89_p1 = scmp.eq.s32.totalorder %s88_s20, 0  ;;  %p102_p2 = scmp.eq.s32.totalorder %s574_s16, 3 }
   0x7   : > { %p107_p3 = scmp.ne.s32.totalorder %s514_s13, %s510_s12  ;;  %p108_p4 = scmp.eq.s32.totalorder %s380_s17, 3 }
   0x8   : > { %s589_s21 = scalar_select %p89_p1, %s518_s14, %s91_s19  }
   0x9   : > { %p591_p5 = por %p102_p2, %p101_p0  ;;  %p595_p6 = por %p108_p4, %p107_p3 }
   0xa   : > { %p383_p7 = scmp.ge.s32.totalorder %s522_s15, 1  ;;  %p139_p8 = scmp.lt.s32.totalorder %s522_s15, 5 }
   0xc   : > { %p140_p9 = pnand %p383_p7, %p139_p8 }
   0xd   : > { %p162_p10 = scmp.lt.s32.totalorder (!%p140_p9), %s574_s16, 3  ;;  %s159_s10 = sand.u32 (!%p140_p9), 1, %s514_s13  }
   0xe   : > { %143 = sbr.rel (%p140_p9) target bundleno = 210 (0xd2), region = 32  ;;  %s389_s11 = sshll.u32 (!%p140_p9), %s574_s16, 3 }
   0xf   : > { %s384_s17 = sshll.u32 (!%p140_p9), %s159_s10, 4  ;;  %s314_s24 = scalar_lea.hbm (!%p140_p9), %s657_s3, %s389_s11 }
  0x10   : > { %s317_s26 = sshll.u32 (!%p140_p9), %s314_s24, 4  ;;  %s304_s27 = scalar_lea.sflag (!%p140_p9), [#allocation3], %s159_s10  ;;  %s318_s26 = int_to_ptr.hbm [resolvable:$true] %s317_s26 }
  0x11   : > { %s474_s28 = sshra.s32 (!%p140_p9), %s318_s26, 4  ;;  %s475_s28 = int_to_ptr.hbm [resolvable:$true] %s474_s28 }
  0x12   : > { %s476_s29 = scalar_lea.hbm (!%p140_p9), %s475_s28, 16  ;;  %p481_p0 = scmp.lt.s32.totalorder (!%p140_p9), %s475_s28, %s657_s3 }
  0x13   : > { %v169_v0 = vld [vmem:[%s656_s2] sm:$0xff]  ;;  %v524_v2 = vmov 0   ;;  %v525_v3 = vmov 1   ;;  %v170_v4 = vld [vmem:[%s656_s2 + $0x8] sm:$0xf]  ;;  %v526_v6 = vmov 2   ;;  %p477_p11 = scmp.ne.s32.totalorder %s475_s28, %s476_s29 }
  0x14   : > { %v167_v1 = vld [vmem:[%s655_s1] sm:$0xff]  ;;  %441 = vset.pattern.permute.xlu1 %v524_v2  ;;  %440 = vset.pattern.permute.xlu0 %v524_v2  ;;  %v168_v5 = vld [vmem:[%s655_s1 + $0x8] sm:$0xf]  ;;  %v527_v7 = vmov 3   ;;  %v528_v8 = vmov 4   ;;  %v529_v9 = vmov 5  }
  0x15   : > { %186 = vperm.xlu1 %441, %v169_v0   ;;  %173 = vperm.xlu0 %440, %v167_v1   ;;  %s163_s5 = scalar_select %p162_p10, %s574_s16, 3 }
  0x16   : > { %442 = vset.pattern.permute.xlu2 %v525_v3  ;;  %s161_s16 = scalar_lea.vmem [#allocation2], %s384_s17  ;;  %p478_p12 = pnand %p477_p11, %p591_p5 }
  0x17   : > { %197 = vperm.xlu2 %442, %v167_v1   ;;  %s385_s6 = sshll.u32 %s163_s5, 3  ;;  %s315_s25 = sshll.u32 %s161_s16, 4  ;;  %s316_s25 = int_to_ptr.vmem [resolvable:$true] %s315_s25 }
  0x18   : > { %s165_s9 = scalar_lea.vmem %s654_s0, %s385_s6  ;;  %p479_p13 = pneg %p478_p12 }
  0x19   : > { %v166_v17 = vld [vmem:[%s165_s9] sm:$0x3f]  ;;  %s480_s5 = scalar_lea.hbm %s657_s3, 64 }
  0x1a   : > { %v181_v18 = vperm.slane %v166_v17, 0  ;;  %v204_v24 = vperm.slane %v166_v17, 1  ;;  %v217_v25 = vperm.slane %v166_v17, 2  ;;  %v230_v32 = vperm.slane %v166_v17, 3  ;;  %p482_p1 = scmp.lt.s32.totalorder %s480_s5, %s476_s29 }
  0x1b   : > { %v243_v34 = vperm.slane %v166_v17, 4  ;;  %v256_v36 = vperm.slane %v166_v17, 5 }
  0x1c   : > { %p483_p2 = por %p482_p1, %p481_p0 }
  0x1d   : > { %191 = vperm.xlu1 %441, %v170_v4   ;;  %178 = vperm.xlu0 %440, %v168_v5  }
  0x1e   : > { %p484_p3 = pnand %p483_p2, %p479_p13 }
  0x1f   : > { %201 = vperm.xlu2 %442, %v168_v5  }
  0x25   : > { %444 = vset.pattern.permute.xlu1 %v526_v6  ;;  %443 = vset.pattern.permute.xlu0 %v526_v6 }
  0x26   : > { %214 = vperm.xlu1 %444, %v168_v5   ;;  %210 = vperm.xlu0 %443, %v167_v1  }
  0x27   : > { %445 = vset.pattern.permute.xlu2 %v527_v7 }
  0x28   : > { %223 = vperm.xlu2 %445, %v167_v1  }
  0x2e   : > { %446 = vset.pattern.permute.xlu1 %v527_v7  ;;  %448 = vset.pattern.permute.xlu0 %v528_v8 }
  0x2f   : > { %227 = vperm.xlu1 %446, %v168_v5   ;;  %240 = vperm.xlu0 %448, %v168_v5  }
  0x30   : > { %447 = vset.pattern.permute.xlu2 %v528_v8 }
  0x31   : > { %236 = vperm.xlu2 %447, %v167_v1  }
  0x37   : > { %449 = vset.pattern.permute.xlu1 %v529_v9  ;;  %451 = vset.pattern.permute.xlu0 %v529_v9 }
  0x38   : > { %249 = vperm.xlu1 %449, %v167_v1  }
  0x39   : > { %450 = vset.pattern.permute.xlu2 %v529_v9 }
  0x3a   : > { %253 = vperm.xlu2 %450, %v168_v5  }
  0x71   : > { %v198_v10 = vpop.permute.xlu2 %197 }
  0x72   : > { %v205_v30 = vmul.f32 %v204_v24, %v198_v10 }
  0x79   : > { %v202_v11 = vpop.permute.xlu2 %201 }
  0x7a   : > { %v206_v28 = vmul.f32 %v204_v24, %v202_v11 }
  0x82   : > { %v224_v14 = vpop.permute.xlu2 %223 }
  0x83   : > { %v231_v46 = vmul.f32 %v230_v32, %v224_v14 }
  0x87   : > { %v187_v12 = vpop.permute.xlu1 %186  ;;  %v174_v13 = vpop.permute.xlu0 %173 }
  0x88   : > { %v182_v22 = vmul.f32 %v181_v18, %v174_v13 }
  0x8a   : > { %v194_v27 = vadd.f32 %v187_v12, %v182_v22 }
  0x8b   : > { %v237_v19 = vpop.permute.xlu2 %236 }
  0x8c   : > { %v207_v37 = vadd.f32 %v205_v30, %v194_v27  ;;  %v244_v49 = vmul.f32 %v243_v34, %v237_v19 }
  0x8f   : > { %v192_v15 = vpop.permute.xlu1 %191  ;;  %v179_v16 = vpop.permute.xlu0 %178 }
  0x90   : > { %v183_v20 = vmul.f32 %v181_v18, %v179_v16 }
  0x92   : > { %v195_v26 = vadd.f32 %v192_v15, %v183_v20 }
  0x94   : > { %v208_v33 = vadd.f32 %v206_v28, %v195_v26  ;;  %v254_v35 = vpop.permute.xlu2 %253 }
  0x95   : > { %v258_v45 = vmul.f32 %v256_v36, %v254_v35 }
  0x98   : > { %v215_v21 = vpop.permute.xlu1 %214  ;;  %v211_v23 = vpop.permute.xlu0 %210 }
  0x99   : > { %v219_v29 = vmul.f32 %v217_v25, %v215_v21  ;;  %v218_v31 = vmul.f32 %v217_v25, %v211_v23 }
  0x9b   : > { %v221_v40 = vadd.f32 %v219_v29, %v208_v33  ;;  %v220_v43 = vadd.f32 %v218_v31, %v207_v37 }
  0x9d   : > { %v233_v48 = vadd.f32 %v231_v46, %v220_v43 }
  0x9f   : > { %v246_v53 = vadd.f32 %v244_v49, %v233_v48 }
  0xa1   : > { %v228_v38 = vpop.permute.xlu1 %227  ;;  %v241_v39 = vpop.permute.xlu0 %240 }
  0xa2   : > { %v232_v41 = vmul.f32 %v230_v32, %v228_v38  ;;  %v245_v42 = vmul.f32 %v243_v34, %v241_v39 }
  0xa4   : > { %v234_v44 = vadd.f32 %v232_v41, %v221_v40 }
  0xa6   : > { %v247_v47 = vadd.f32 %v245_v42, %v234_v44 }
  0xa8   : > { %v260_v50 = vadd.f32 %v258_v45, %v247_v47 }
  0xaa   : > { %v387_v51 = vmul.f32 -1.442695, %v260_v50  ;;  %v250_v52 = vpop.permute.xlu1 %249 }
  0xab   : > { %v257_v54 = vmul.f32 %v256_v36, %v250_v52 }
  0xac   : > { %452 = vpow2.f32 %v387_v51 }
  0xad   : > { %v259_v55 = vadd.f32 %v257_v54, %v246_v53 }
  0xaf   : > { %v386_v56 = vmul.f32 -1.442695, %v259_v55 }
  0xb1   : > { %454 = vpow2.f32 %v386_v56 }
  0xb2   : > { %v453_v57 = vpop.eup %452 }
  0xb3   : > { %v268_v58 = vadd.f32 1.0, %v453_v57 }
  0xb5   : > { %456 = vrcp.f32 %v268_v58  ;;  %v295_v0 = vand.u32 2147483648, %v268_v58  ;;  %v293_v3 = vand.u32 2147483647, %v268_v58  ;;  %vm289_vm1 = vweird.f32 %v268_v58 }
  0xb7   : > { %v455_v59 = vpop.eup %454  ;;  %v296_v6 = vor.u32 1.1754944e-38, %v295_v0  ;;  %vm294_vm3 = vcmp.eq.f32.partialorder %v293_v3, 8.507059e+37 }
  0xb8   : > { %v267_v60 = vadd.f32 1.0, %v455_v59 }
  0xba   : > { %458 = vrcp.f32 %v267_v60  ;;  %v280_v9 = vand.u32 2147483648, %v267_v60  ;;  %v278_v12 = vand.u32 2147483647, %v267_v60  ;;  %vm274_vm5 = vweird.f32 %v267_v60 }
  0xbb   : > { %v457_v61 = vpop.eup %456 }
  0xbc   : > { %v285_v62 = vmul.f32 %v457_v61, %v268_v58  ;;  %vm290_vm0 = vweird.f32 %v457_v61  ;;  %v281_v15 = vor.u32 1.1754944e-38, %v280_v9  ;;  %vm279_vm7 = vcmp.eq.f32.partialorder %v278_v12, 8.507059e+37 }
  0xbd   : > { %vm291_vm2 = vmor %vm289_vm1, %vm290_vm0 }
  0xbe   : > { %v286_v63 = vsub.f32 1.0, %v285_v62 }
  0xc0   : > { %v459_v1 = vpop.eup %458  ;;  %v287_v2 = vmul.f32 %v457_v61, %v286_v63 }
  0xc1   : > { %v270_v4 = vmul.f32 %v459_v1, %v267_v60  ;;  %vm275_vm4 = vweird.f32 %v459_v1 }
  0xc2   : > { %v288_v5 = vadd.f32 %v457_v61, %v287_v2  ;;  %vm276_vm6 = vmor %vm274_vm5, %vm275_vm4 }
  0xc3   : > { %v271_v7 = vsub.f32 1.0, %v270_v4 }
  0xc4   : > { %v292_v8 = vsel %vm291_vm2, %v457_v61, %v288_v5 }
  0xc5   : > { %v297_v10 = vsel %vm294_vm3, %v296_v6, %v292_v8  ;;  %v272_v11 = vmul.f32 %v459_v1, %v271_v7 }
  0xc6   : > { %v300_v13 = vmul.f32 %v297_v10, %v260_v50 }
  0xc7   : > { %v273_v14 = vadd.f32 %v459_v1, %v272_v11 }
  0xc8   : > { %302 = vst [vmem:[%s161_s16 + $0x8] sm:$0xf] %v300_v13 }
  0xc9   : > { %v277_v16 = vsel %vm276_vm6, %v459_v1, %v273_v14 }
  0xca   : > { %v282_v17 = vsel %vm279_vm7, %v281_v15, %v277_v16 }
  0xcb   : > { %v299_v18 = vmul.f32 %v282_v17, %v259_v55 }
  0xcd   : > { %301 = vst [vmem:[%s161_s16] sm:$0xff] %v299_v18 }
  0xce   : > { %487 = shalt.err (!%p484_p3)
}
  0xcf   : > { %s530_s8 = smov 128   ;;  %s531_s9 = smov 512  }
  0xd0   : > { %s532_s10 = smov 8  }
  0xd1   : > { %392 = dma.vmem_to_hbm [thread:$0]  (%p591_p5), %s316_s25, 256, %s318_s26, %s304_s27, %s530_s8, %s531_s9, %s532_s10  }
  0xd2 PF: > { %p398_p4 = scmp.ge.s32.totalorder %s522_s15, 2  ;;  %s332_s11 = sand.u32 1, %s510_s12  }
  0xd3   : > { %s333_s17 = scalar_lea.sflag [#allocation3], %s332_s11 }
  0xd4   : > { %p395_p7 = pnand %p398_p4, %p595_p6 }
  0xd6   : > { %p396_p8 = pneg %p395_p7 }
  0xd8   : > { %505 = dma.done.wait (%p396_p8), %s333_s17, 256  }
  0xd9   : > { %507 = vsyncadd (%p396_p8), %s333_s17, 4294967040  ;;  %p13_p9 = scmp.ge.s32.totalorder %s578_s18, 6   ;;  %s660_s12 = smov %s514_s13 }
  0xda   : > { %s661_s13 = smov %s518_s14  ;;  %s662_s14 = smov %s589_s21 }
  0xdb   : > { %s663_s15 = smov %s578_s18  ;;  %15 = sbr.rel (!%p13_p9) target bundleno = 3 (0x3), region = 67 }
  0xe0   :  { %339 = vsyncpa [#allocation3], 1 }
  0xe1   :  { %341 = vsyncpa [#allocation3 + $0x1], 1 }

</bundles_post_ra>
